<compile_context>
chip_gen: v7x
topology: tpu7x:2x2x1
jax: 0.10.0
libtpu: 0.0.40
codegen_flags: <defaults>
</compile_context>

<pallas_src>
import jax
import jax.numpy as jnp
from jax import lax
from jax.experimental import pallas as pl
from jax.experimental.pallas import tpu as pltpu


# ---------------------------------------------------------------------------
# Fused forward kernel
# ---------------------------------------------------------------------------
def fused_forward_kernel(um_idx_ref, me_idx_ref,
                         user_x_ref, movie_x_ref, entity_x_ref,
                         ngcf_w_ref, ngcf_b_ref, rgcn_w_ref, rgcn_b_ref,
                         user_out_ref, movie_out_ref):
    f32, bf16 = jnp.float32, jnp.bfloat16

    user_x = user_x_ref[...]            # (Nu, H) f32
    movie_x = movie_x_ref[...]          # (Nm, H) f32
    entity_x = entity_x_ref[...]        # (Ne, H) f32
    ngcf_w = ngcf_w_ref[...]            # (2H, H) bf16 == [w1^T ; w2^T]
    ngcf_b = ngcf_b_ref[...]            # (1, H)  f32  == b1 + b2
    rgcn_w = rgcn_w_ref[...]            # (2H, H) bf16 == [w0 ; w_root]
    rgcn_b = rgcn_b_ref[...]            # (1, H)  f32

    def one_hot(idx_col, n, dtype):
        # idx_col: (E, 1) int32 -> (E, n) one-hot built in-register (VPU).
        iota = lax.broadcasted_iota(jnp.int32, (idx_col.shape[0], n), 1)
        return (idx_col == iota).astype(dtype)

    def ngcf(x, idx_both, reverse):
        # x: (N, H) f32.  idx_both: (2E, 1) int32 = [src ; dst].
        # out[d] += lin1(x[s]) + lin2(x[d] * x[s])   (aggr='add')
        n = x.shape[0]
        e = idx_both.shape[0] // 2
        x_bf = x.astype(bf16)
        # Single merged gather for x_src and x_dst: (2E, N) @ (N, H).
        g_all = one_hot(idx_both, n, bf16)
        xg = jnp.dot(g_all, x_bf, preferred_element_type=f32)        # (2E, H)
        if reverse:   # reversed edges: src'=dst, dst'=src
            x_src, x_dst, scat_idx = xg[e:], xg[:e], idx_both[:e]
        else:
            x_src, x_dst, scat_idx = xg[:e], xg[e:], idx_both[e:]
        # Merged lin1/lin2: [x_j | x_i*x_j] @ [w1^T ; w2^T]  (f32 elementwise).
        feat = jnp.concatenate([x_src, x_src * x_dst], axis=1)        # (E, 2H)
        msg = jnp.dot(feat.astype(bf16), ngcf_w,
                      preferred_element_type=f32) + ngcf_b            # (E, H)
        # Scatter-add to destination nodes: G_dst^T @ msg.
        g_scat = one_hot(scat_idx, n, bf16)                           # (E, N)
        return lax.dot_general(g_scat, msg.astype(bf16),
                               (((0,), (0,)), ((), ())),
                               preferred_element_type=f32)            # (N, H)

    def rgcn(x, idx_both):
        # Single active relation (edge_type == 0), aggr='mean':
        #   out = mean_agg(x[src] -> dst) @ w0 + x @ w_root + bias
        n = x.shape[0]
        e = idx_both.shape[0] // 2
        gsrc = one_hot(idx_both[:e], n, bf16)                         # (E, N)
        gdst = one_hot(idx_both[e:], n, f32)                          # (E, N)
        x_src = jnp.dot(gsrc, x.astype(bf16),
                        preferred_element_type=f32)                   # (E, H)
        # Degree via sublane reduction + EUP reciprocal, folded into scatter.
        deg = jnp.sum(gdst, axis=0, keepdims=True)                    # (1, N)
        inv = jnp.where(deg > 0.0, pl.reciprocal(deg, approx=True), 0.0)
        g_mean = (gdst * inv).astype(bf16)                            # (E, N)
        agg = lax.dot_general(g_mean, x_src.astype(bf16),
                              (((0,), (0,)), ((), ())),
                              preferred_element_type=f32)             # (N, H)
        # Merged [agg | x] @ [w0 ; w_root] + bias.
        feat = jnp.concatenate([agg, x], axis=1).astype(bf16)         # (N, 2H)
        return jnp.dot(feat, rgcn_w, preferred_element_type=f32) + rgcn_b

    um_idx = um_idx_ref[...]            # (2*E_um, 1) int32
    me_idx = me_idx_ref[...]            # (2*E_me, 1) int32
    n_m = movie_x.shape[0]

    movie_msg = ngcf(movie_x, um_idx, reverse=False)                  # (Nm, H)
    entity_msg = rgcn(entity_x, me_idx)                               # (Ne, H)
    movie_out_ref[...] = jnp.concatenate(
        [movie_x, movie_msg + entity_msg[:n_m]], axis=1)              # (Nm, 2H)

    user_msg = ngcf(user_x, um_idx, reverse=True)                     # (Nu, H)
    user_out_ref[...] = jnp.concatenate([user_x, user_msg], axis=1)   # (Nu, 2H)


# ---------------------------------------------------------------------------
# Wrapper: weight stacking, index packing, pallas_call
# ---------------------------------------------------------------------------
def _cost_estimate(n_u, n_m, n_e, e_um, e_me, h):
    flops = 0
    for n in (n_m, n_u):                       # two NGCF passes
        flops += 2 * (2 * e_um) * n * h        # merged gather
        flops += 2 * e_um * (2 * h) * h        # merged lin1/lin2
        flops += 2 * e_um * n * h              # scatter-add
        flops += 4 * e_um * h                  # x_i*x_j, bias adds
    flops += 2 * e_me * n_e * h                # RGCN gather
    flops += 2 * e_me * n_e * h                # RGCN mean scatter
    flops += 2 * n_e * (2 * h) * h             # [agg|x] @ [w0;root]
    bytes_accessed = (4 * (2 * e_um + 2 * e_me)              # edge indices
                      + 4 * h * (n_u + n_m + n_e)            # node features
                      + 2 * (2 * h * h) * 2 + 4 * 2 * h      # weights / biases
                      + 4 * 2 * h * (n_u + n_m))             # outputs
    return pl.CostEstimate(flops=int(flops), transcendentals=int(n_e),
                           bytes_accessed=int(bytes_accessed))


def movie_rec_gnn_forward(params, user_x, movie_x, entity_x,
                          um_edge_index, me_edge_index):
    n_u, h = user_x.shape
    n_m = movie_x.shape[0]
    n_e = entity_x.shape[0]
    e_um = um_edge_index.shape[1]
    e_me = me_edge_index.shape[1]

    # Edge indices packed as [src ; dst] int32 columns (O(E) bytes of HBM).
    um_idx = jnp.concatenate([um_edge_index[0], um_edge_index[1]],
                             axis=0).astype(jnp.int32)[:, None]       # (2E_um,1)
    me_idx = jnp.concatenate([me_edge_index[0], me_edge_index[1]],
                             axis=0).astype(jnp.int32)[:, None]       # (2E_me,1)

    # torch Linear stores weight as [out, in]; transpose so we can do x @ W.
    ngcf_w = jnp.concatenate([params["ngcf_w1"].T, params["ngcf_w2"].T],
                             axis=0).astype(jnp.bfloat16)             # (2H, H)
    ngcf_b = (params["ngcf_b1"] + params["ngcf_b2"])[None, :].astype(jnp.float32)
    rgcn_w = jnp.concatenate([params["rgcn_w"][0], params["rgcn_root"]],
                             axis=0).astype(jnp.bfloat16)             # (2H, H)
    rgcn_b = params["rgcn_bias"][None, :].astype(jnp.float32)

    vmem = pl.BlockSpec(memory_space=pltpu.MemorySpace.VMEM)
    user_emb, movie_emb = pl.pallas_call(
        fused_forward_kernel,
        out_shape=(jax.ShapeDtypeStruct((n_u, 2 * h), jnp.float32),
                   jax.ShapeDtypeStruct((n_m, 2 * h), jnp.float32)),
        in_specs=[vmem] * 9,
        out_specs=(vmem, vmem),
        compiler_params=pltpu.CompilerParams(
            vmem_limit_bytes=32 * 1024 * 1024),
        cost_estimate=_cost_estimate(n_u, n_m, n_e, e_um, e_me, h),
    )(um_idx, me_idx,
      user_x.astype(jnp.float32), movie_x.astype(jnp.float32),
      entity_x.astype(jnp.float32),
      ngcf_w, ngcf_b, rgcn_w, rgcn_b)
    return user_emb, movie_emb


# ---------------------------------------------------------------------------
# Pure-JAX f32 reference (for a correctness check of the fused kernel)
# ---------------------------------------------------------------------------
def _ngcf_ref(x, src, dst, w1, b1, w2, b2):
    xs, xd = x[src], x[dst]
    msg = xs @ w1.T + b1 + (xs * xd) @ w2.T + b2
    return jnp.zeros_like(x).at[dst].add(msg)


def _rgcn_ref(x, src, dst, w0, root, bias):
    n, h = x.shape
    summed = jnp.zeros((n, h), jnp.float32).at[dst].add(x[src])
    deg = jnp.zeros((n,), jnp.float32).at[dst].add(1.0)
    inv = jnp.where(deg > 0, 1.0 / jnp.maximum(deg, 1.0), 0.0)[:, None]
    return (summed * inv) @ w0 + x @ root + bias


def _forward_ref(params, user_x, movie_x, entity_x, um, me):
    movie_msg = _ngcf_ref(movie_x, um[0], um[1], params["ngcf_w1"],
                          params["ngcf_b1"], params["ngcf_w2"], params["ngcf_b2"])
    entity_msg = _rgcn_ref(entity_x, me[0], me[1], params["rgcn_w"][0],
                           params["rgcn_root"], params["rgcn_bias"])
    movie_emb = jnp.concatenate(
        [movie_x, movie_msg + entity_msg[:movie_msg.shape[0]]], axis=1)
    user_msg = _ngcf_ref(user_x, um[1], um[0], params["ngcf_w1"],
                         params["ngcf_b1"], params["ngcf_w2"], params["ngcf_b2"])
    user_emb = jnp.concatenate([user_x, user_msg], axis=1)
    return user_emb, movie_emb


if __name__ == "__main__":
    H = 32                 # hidden_channels
    NUM_RELATIONS = 3
    N_USERS = 16
    N_MOVIES = 16          # == N_USERS so reversed edge indexing stays in range
    N_ENTITIES = 24
    E_UM = 40
    E_ME = 48

    key = jax.random.PRNGKey(0)
    keys = jax.random.split(key, 12)

    # deterministic synthetic parameters (Linear: weight [out,in], bias [out])
    params = {
        "ngcf_w1": jax.random.normal(keys[0], (H, H), jnp.float32) * 0.1,
        "ngcf_b1": jax.random.normal(keys[1], (H,), jnp.float32) * 0.1,
        "ngcf_w2": jax.random.normal(keys[2], (H, H), jnp.float32) * 0.1,
        "ngcf_b2": jax.random.normal(keys[3], (H,), jnp.float32) * 0.1,
        "rgcn_w": jax.random.normal(keys[4], (NUM_RELATIONS, H, H), jnp.float32) * 0.1,
        "rgcn_root": jax.random.normal(keys[5], (H, H), jnp.float32) * 0.1,
        "rgcn_bias": jax.random.normal(keys[6], (H,), jnp.float32) * 0.1,
    }

    user_x = jax.random.normal(keys[7], (N_USERS, H), jnp.float32)
    movie_x = jax.random.normal(keys[8], (N_MOVIES, H), jnp.float32)
    entity_x = jax.random.normal(keys[9], (N_ENTITIES, H), jnp.float32)

    um_edge_index = jnp.stack([
        jax.random.randint(keys[10], (E_UM,), 0, N_USERS),
        jax.random.randint(jax.random.fold_in(keys[10], 1), (E_UM,), 0, N_MOVIES),
    ], axis=0)
    me_edge_index = jnp.stack([
        jax.random.randint(keys[11], (E_ME,), 0, N_MOVIES),
        jax.random.randint(jax.random.fold_in(keys[11], 1), (E_ME,), 0, N_ENTITIES),
    ], axis=0)

    fwd = jax.jit(movie_rec_gnn_forward)
    user_emb, movie_emb = fwd(params, user_x, movie_x, entity_x,
                              um_edge_index, me_edge_index)
    jax.block_until_ready((user_emb, movie_emb))

    user_ref, movie_ref = _forward_ref(
        params, user_x, movie_x, entity_x, um_edge_index, me_edge_index)
    assert user_emb.shape == (N_USERS, 2 * H)
    assert movie_emb.shape == (N_MOVIES, 2 * H)
    # Tolerance loosened vs f32 reference because MXU operands are bf16 and the
    # RGCN degree reciprocal is the approx EUP path; a structurally wrong
    # kernel would be off by O(1), far outside this band.
    assert jnp.allclose(user_emb, user_ref, atol=5e-2, rtol=5e-2)
    assert jnp.allclose(movie_emb, movie_ref, atol=5e-2, rtol=5e-2)

    print("KERNEL_OK")
</pallas_src>

<mosaic_0001>
module attributes {stable_mosaic.version = 11 : i64} {
  func.func @fused_forward_kernel(%arg0: memref<80x1xi32, #tpu.memory_space<vmem>>, %arg1: memref<96x1xi32, #tpu.memory_space<vmem>>, %arg2: memref<16x32xf32, #tpu.memory_space<vmem>>, %arg3: memref<16x32xf32, #tpu.memory_space<vmem>>, %arg4: memref<24x32xf32, #tpu.memory_space<vmem>>, %arg5: memref<64x32xbf16, #tpu.memory_space<vmem>>, %arg6: memref<1x32xf32, #tpu.memory_space<vmem>>, %arg7: memref<64x32xbf16, #tpu.memory_space<vmem>>, %arg8: memref<1x32xf32, #tpu.memory_space<vmem>>, %arg9: memref<16x64xf32, #tpu.memory_space<vmem>>, %arg10: memref<16x64xf32, #tpu.memory_space<vmem>>) attributes {dimension_semantics = [], scalar_prefetch = 0 : i64, scratch_operands = 0 : i64, tpu.core_type = #tpu.core_type<tc>} {
    %c0 = arith.constant 0 : index
    %c0_0 = arith.constant 0 : index
    %0 = vector.load %arg2[%c0, %c0_0] : memref<16x32xf32, #tpu.memory_space<vmem>>, vector<16x32xf32>
    %c0_1 = arith.constant 0 : index
    %c0_2 = arith.constant 0 : index
    %1 = vector.load %arg3[%c0_1, %c0_2] : memref<16x32xf32, #tpu.memory_space<vmem>>, vector<16x32xf32>
    %c0_3 = arith.constant 0 : index
    %c0_4 = arith.constant 0 : index
    %2 = vector.load %arg4[%c0_3, %c0_4] : memref<24x32xf32, #tpu.memory_space<vmem>>, vector<24x32xf32>
    %c0_5 = arith.constant 0 : index
    %c0_6 = arith.constant 0 : index
    %3 = vector.load %arg5[%c0_5, %c0_6] : memref<64x32xbf16, #tpu.memory_space<vmem>>, vector<64x32xbf16>
    %c0_7 = arith.constant 0 : index
    %c0_8 = arith.constant 0 : index
    %4 = vector.load %arg6[%c0_7, %c0_8] : memref<1x32xf32, #tpu.memory_space<vmem>>, vector<1x32xf32>
    %c0_9 = arith.constant 0 : index
    %c0_10 = arith.constant 0 : index
    %5 = vector.load %arg7[%c0_9, %c0_10] : memref<64x32xbf16, #tpu.memory_space<vmem>>, vector<64x32xbf16>
    %c0_11 = arith.constant 0 : index
    %c0_12 = arith.constant 0 : index
    %6 = vector.load %arg8[%c0_11, %c0_12] : memref<1x32xf32, #tpu.memory_space<vmem>>, vector<1x32xf32>
    %c0_13 = arith.constant 0 : index
    %c0_14 = arith.constant 0 : index
    %7 = vector.load %arg0[%c0_13, %c0_14] : memref<80x1xi32, #tpu.memory_space<vmem>>, vector<80x1xi32>
    %c0_15 = arith.constant 0 : index
    %c0_16 = arith.constant 0 : index
    %8 = vector.load %arg1[%c0_15, %c0_16] : memref<96x1xi32, #tpu.memory_space<vmem>>, vector<96x1xi32>
    %9 = arith.truncf %1 : vector<16x32xf32> to vector<16x32xbf16>
    %10 = tpu.iota {dimensions = array<i32: 1>} : vector<80x16xi32>
    %11 = vector.broadcast %7 : vector<80x1xi32> to vector<80x16xi32>
    %12 = arith.cmpi eq, %11, %10 : vector<80x16xi32>
    %13 = arith.extui %12 : vector<80x16xi1> to vector<80x16xi32>
    %14 = arith.sitofp %13 : vector<80x16xi32> to vector<80x16xf32>
    %15 = arith.truncf %14 : vector<80x16xf32> to vector<80x16xbf16>
    %cst = arith.constant dense<0.000000e+00> : vector<80x32xf32>
    %16 = tpu.matmul %15, %9, %cst {dimension_numbers = #tpu.dot_dimension_numbers<[1], [0], [0], [1], [0, 0, 1, 1], [], []>} : vector<80x16xbf16>, vector<16x32xbf16>, vector<80x32xf32> -> vector<80x32xf32>
    %17 = vector.extract_strided_slice %16 {offsets = [0, 0], sizes = [40, 32], strides = [1, 1]} : vector<80x32xf32> to vector<40x32xf32>
    %18 = vector.extract_strided_slice %16 {offsets = [40, 0], sizes = [40, 32], strides = [1, 1]} : vector<80x32xf32> to vector<40x32xf32>
    %19 = vector.extract_strided_slice %7 {offsets = [40, 0], sizes = [40, 1], strides = [1, 1]} : vector<80x1xi32> to vector<40x1xi32>
    %20 = arith.mulf %17, %18 : vector<40x32xf32>
    %21 = tpu.concatenate %17, %20 in 1 : vector<40x32xf32>, vector<40x32xf32> -> vector<40x64xf32>
    %22 = arith.truncf %21 : vector<40x64xf32> to vector<40x64xbf16>
    %cst_17 = arith.constant dense<0.000000e+00> : vector<40x32xf32>
    %23 = tpu.matmul %22, %3, %cst_17 {dimension_numbers = #tpu.dot_dimension_numbers<[1], [0], [0], [1], [0, 0, 1, 1], [], []>} : vector<40x64xbf16>, vector<64x32xbf16>, vector<40x32xf32> -> vector<40x32xf32>
    %24 = vector.broadcast %4 : vector<1x32xf32> to vector<40x32xf32>
    %25 = arith.addf %23, %24 : vector<40x32xf32>
    %26 = tpu.iota {dimensions = array<i32: 1>} : vector<40x16xi32>
    %27 = vector.broadcast %19 : vector<40x1xi32> to vector<40x16xi32>
    %28 = arith.cmpi eq, %27, %26 : vector<40x16xi32>
    %29 = arith.extui %28 : vector<40x16xi1> to vector<40x16xi32>
    %30 = arith.sitofp %29 : vector<40x16xi32> to vector<40x16xf32>
    %31 = arith.truncf %30 : vector<40x16xf32> to vector<40x16xbf16>
    %32 = arith.truncf %25 : vector<40x32xf32> to vector<40x32xbf16>
    %cst_18 = arith.constant dense<0.000000e+00> : vector<16x32xf32>
    %33 = tpu.matmul %31, %32, %cst_18 {dimension_numbers = #tpu.dot_dimension_numbers<[0], [0], [1], [1], [0, 1, 1, 1], [], []>} : vector<40x16xbf16>, vector<40x32xbf16>, vector<16x32xf32> -> vector<16x32xf32>
    %34 = vector.extract_strided_slice %8 {offsets = [0, 0], sizes = [48, 1], strides = [1, 1]} : vector<96x1xi32> to vector<48x1xi32>
    %35 = tpu.iota {dimensions = array<i32: 1>} : vector<48x24xi32>
    %36 = vector.broadcast %34 : vector<48x1xi32> to vector<48x24xi32>
    %37 = arith.cmpi eq, %36, %35 : vector<48x24xi32>
    %38 = arith.extui %37 : vector<48x24xi1> to vector<48x24xi32>
    %39 = arith.sitofp %38 : vector<48x24xi32> to vector<48x24xf32>
    %40 = arith.truncf %39 : vector<48x24xf32> to vector<48x24xbf16>
    %41 = vector.extract_strided_slice %8 {offsets = [48, 0], sizes = [48, 1], strides = [1, 1]} : vector<96x1xi32> to vector<48x1xi32>
    %42 = tpu.iota {dimensions = array<i32: 1>} : vector<48x24xi32>
    %43 = vector.broadcast %41 : vector<48x1xi32> to vector<48x24xi32>
    %44 = arith.cmpi eq, %43, %42 : vector<48x24xi32>
    %45 = arith.extui %44 : vector<48x24xi1> to vector<48x24xi32>
    %46 = arith.sitofp %45 : vector<48x24xi32> to vector<48x24xf32>
    %47 = arith.truncf %2 : vector<24x32xf32> to vector<24x32xbf16>
    %cst_19 = arith.constant dense<0.000000e+00> : vector<48x32xf32>
    %48 = tpu.matmul %40, %47, %cst_19 {dimension_numbers = #tpu.dot_dimension_numbers<[1], [0], [0], [1], [0, 0, 1, 1], [], []>} : vector<48x24xbf16>, vector<24x32xbf16>, vector<48x32xf32> -> vector<48x32xf32>
    %cst_20 = arith.constant dense<0.000000e+00> : vector<24xf32>
    %49 = vector.multi_reduction <add>, %46, %cst_20 [0] : vector<48x24xf32> to vector<24xf32>
    %50 = vector.shape_cast %49 : vector<24xf32> to vector<1x24xf32>
    %cst_21 = arith.constant 0.000000e+00 : f32
    %51 = vector.broadcast %cst_21 : f32 to vector<1x24xf32>
    %52 = arith.cmpf ogt, %50, %51 : vector<1x24xf32>
    %53 = tpu.reciprocal %50 {approx = true} : vector<1x24xf32> -> vector<1x24xf32>
    %cst_22 = arith.constant 0.000000e+00 : f32
    %54 = vector.broadcast %cst_22 : f32 to vector<1x24xf32>
    %55 = arith.select %52, %53, %54 : vector<1x24xi1>, vector<1x24xf32>
    %56 = vector.broadcast %55 : vector<1x24xf32> to vector<48x24xf32>
    %57 = arith.mulf %46, %56 : vector<48x24xf32>
    %58 = arith.truncf %57 : vector<48x24xf32> to vector<48x24xbf16>
    %59 = arith.truncf %48 : vector<48x32xf32> to vector<48x32xbf16>
    %cst_23 = arith.constant dense<0.000000e+00> : vector<24x32xf32>
    %60 = tpu.matmul %58, %59, %cst_23 {dimension_numbers = #tpu.dot_dimension_numbers<[0], [0], [1], [1], [0, 1, 1, 1], [], []>} : vector<48x24xbf16>, vector<48x32xbf16>, vector<24x32xf32> -> vector<24x32xf32>
    %61 = tpu.concatenate %60, %2 in 1 : vector<24x32xf32>, vector<24x32xf32> -> vector<24x64xf32>
    %62 = arith.truncf %61 : vector<24x64xf32> to vector<24x64xbf16>
    %cst_24 = arith.constant dense<0.000000e+00> : vector<24x32xf32>
    %63 = tpu.matmul %62, %5, %cst_24 {dimension_numbers = #tpu.dot_dimension_numbers<[1], [0], [0], [1], [0, 0, 1, 1], [], []>} : vector<24x64xbf16>, vector<64x32xbf16>, vector<24x32xf32> -> vector<24x32xf32>
    %64 = vector.broadcast %6 : vector<1x32xf32> to vector<24x32xf32>
    %65 = arith.addf %63, %64 : vector<24x32xf32>
    %66 = vector.extract_strided_slice %65 {offsets = [0, 0], sizes = [16, 32], strides = [1, 1]} : vector<24x32xf32> to vector<16x32xf32>
    %67 = arith.addf %33, %66 : vector<16x32xf32>
    %68 = tpu.concatenate %1, %67 in 1 : vector<16x32xf32>, vector<16x32xf32> -> vector<16x64xf32>
    %c0_25 = arith.constant 0 : index
    %c0_26 = arith.constant 0 : index
    %69 = vector.load %arg10[%c0_25, %c0_26] : memref<16x64xf32, #tpu.memory_space<vmem>>, vector<16x64xf32>
    tpu.vector_store %arg10[%c0_25, %c0_26], %68 {strides = array<i32>} : memref<16x64xf32, #tpu.memory_space<vmem>>, vector<16x64xf32>,
    %70 = arith.truncf %0 : vector<16x32xf32> to vector<16x32xbf16>
    %71 = tpu.iota {dimensions = array<i32: 1>} : vector<80x16xi32>
    %72 = vector.broadcast %7 : vector<80x1xi32> to vector<80x16xi32>
    %73 = arith.cmpi eq, %72, %71 : vector<80x16xi32>
    %74 = arith.extui %73 : vector<80x16xi1> to vector<80x16xi32>
    %75 = arith.sitofp %74 : vector<80x16xi32> to vector<80x16xf32>
    %76 = arith.truncf %75 : vector<80x16xf32> to vector<80x16xbf16>
    %cst_27 = arith.constant dense<0.000000e+00> : vector<80x32xf32>
    %77 = tpu.matmul %76, %70, %cst_27 {dimension_numbers = #tpu.dot_dimension_numbers<[1], [0], [0], [1], [0, 0, 1, 1], [], []>} : vector<80x16xbf16>, vector<16x32xbf16>, vector<80x32xf32> -> vector<80x32xf32>
    %78 = vector.extract_strided_slice %77 {offsets = [40, 0], sizes = [40, 32], strides = [1, 1]} : vector<80x32xf32> to vector<40x32xf32>
    %79 = vector.extract_strided_slice %77 {offsets = [0, 0], sizes = [40, 32], strides = [1, 1]} : vector<80x32xf32> to vector<40x32xf32>
    %80 = vector.extract_strided_slice %7 {offsets = [0, 0], sizes = [40, 1], strides = [1, 1]} : vector<80x1xi32> to vector<40x1xi32>
    %81 = arith.mulf %78, %79 : vector<40x32xf32>
    %82 = tpu.concatenate %78, %81 in 1 : vector<40x32xf32>, vector<40x32xf32> -> vector<40x64xf32>
    %83 = arith.truncf %82 : vector<40x64xf32> to vector<40x64xbf16>
    %cst_28 = arith.constant dense<0.000000e+00> : vector<40x32xf32>
    %84 = tpu.matmul %83, %3, %cst_28 {dimension_numbers = #tpu.dot_dimension_numbers<[1], [0], [0], [1], [0, 0, 1, 1], [], []>} : vector<40x64xbf16>, vector<64x32xbf16>, vector<40x32xf32> -> vector<40x32xf32>
    %85 = vector.broadcast %4 : vector<1x32xf32> to vector<40x32xf32>
    %86 = arith.addf %84, %85 : vector<40x32xf32>
    %87 = tpu.iota {dimensions = array<i32: 1>} : vector<40x16xi32>
    %88 = vector.broadcast %80 : vector<40x1xi32> to vector<40x16xi32>
    %89 = arith.cmpi eq, %88, %87 : vector<40x16xi32>
    %90 = arith.extui %89 : vector<40x16xi1> to vector<40x16xi32>
    %91 = arith.sitofp %90 : vector<40x16xi32> to vector<40x16xf32>
    %92 = arith.truncf %91 : vector<40x16xf32> to vector<40x16xbf16>
    %93 = arith.truncf %86 : vector<40x32xf32> to vector<40x32xbf16>
    %cst_29 = arith.constant dense<0.000000e+00> : vector<16x32xf32>
    %94 = tpu.matmul %92, %93, %cst_29 {dimension_numbers = #tpu.dot_dimension_numbers<[0], [0], [1], [1], [0, 1, 1, 1], [], []>} : vector<40x16xbf16>, vector<40x32xbf16>, vector<16x32xf32> -> vector<16x32xf32>
    %95 = tpu.concatenate %0, %94 in 1 : vector<16x32xf32>, vector<16x32xf32> -> vector<16x64xf32>
    %c0_30 = arith.constant 0 : index
    %c0_31 = arith.constant 0 : index
    %96 = vector.load %arg9[%c0_30, %c0_31] : memref<16x64xf32, #tpu.memory_space<vmem>>, vector<16x64xf32>
    tpu.vector_store %arg9[%c0_30, %c0_31], %95 {strides = array<i32>} : memref<16x64xf32, #tpu.memory_space<vmem>>, vector<16x64xf32>,
    return
  }
}

</mosaic_0001>

<bundles_post_ra>
// kernel: movie_rec_gnn_forward.1
= control target key start
LH: loop header
LB: loop body
LE: loop exit
PB: predicated region body
PF: predicated region fallthrough
CT: control target
= control target key end

     0   :  { %16 = vsyncpa [#allocation3], 0  ;;  %v1429_v2 = vmov 0   ;;  %v1430_v5 = vmov 0.0   ;;  %vm1431_vm0 = vmmov 0   ;;  %s1949_s0 = inlined_call_operand.vmem [shape: s32[80,1], index: 0, kind: input, shape index: {}]   ;;  %s1950_s1 = inlined_call_operand.vmem [shape: s32[96,1], index: 1, kind: input, shape index: {}]   ;;  %s1951_s2 = inlined_call_operand.vmem [shape: f32[16,32], index: 2, kind: input, shape index: {}]   ;;  %s1952_s3 = inlined_call_operand.vmem [shape: f32[16,32], index: 3, kind: input, shape index: {}]   ;;  %s1953_s4 = inlined_call_operand.vmem [shape: f32[24,32], index: 4, kind: input, shape index: {}]   ;;  %s1954_s5 = inlined_call_operand.vmem [shape: bf16[64,32], index: 5, kind: input, shape index: {}]   ;;  %s1955_s6 = inlined_call_operand.vmem [shape: f32[1,32], index: 6, kind: input, shape index: {}]   ;;  %s1956_s7 = inlined_call_operand.vmem [shape: bf16[64,32], index: 7, kind: input, shape index: {}]   ;;  %s1957_s8 = inlined_call_operand.vmem [shape: f32[1,32], index: 8, kind: input, shape index: {}]   ;;  %s1958_s9 = inlined_call_operand.hbm [shape: f32[16,64], index: 9, kind: output, shape index: {0}]   ;;  %s1959_s10 = inlined_call_operand.hbm [shape: f32[16,64], index: 10, kind: output, shape index: {1}]  }
   0x1   :  { %v64_v0 = vld [vmem:[%s1949_s0 + $0x10] sm:$0xff]  ;;  %v62_v1 = vld [vmem:[%s1949_s0] sm:$0xff]  ;;  %1345 = vset.pattern.permute.xlu1 %v1429_v2  ;;  %1344 = vset.pattern.permute.xlu0 %v1429_v2  ;;  %v65_v3 = vld [vmem:[%s1949_s0 + $0x18] sm:$0xff] }
   0x2   :  { %94 = vperm.xlu1 %1345, %v64_v0   ;;  %88 = vperm.xlu0 %1344, %v62_v1   ;;  %v63_v4 = vld [vmem:[%s1949_s0 + $0x8] sm:$0xff]  ;;  %v1509_v6 = vld [vmem:[%s1952_s3] sm:$0xff] }
   0x3   :  { %1194 = vmatprep.subr.bf16.mxu0 %v1430_v5  ;;  %1216 = vmatprep.subr.bf16.mxu1 %v1430_v5  ;;  %v1514_v7 = vld [vmem:[%s1952_s3 + $0x8] sm:$0xff]  ;;  %v66_v9 = vld [vmem:[%s1949_s0 + $0x20] sm:$0xff] }
   0x4   :  { %v67_v8 = vld [vmem:[%s1949_s0 + $0x28] sm:$0xff]  ;;  %v84_v10 = vpack.c.bf16 %v1514_v7, %v1509_v6  ;;  %1196 = vmatprep.mubr.msk.bf16.mxu0 %vm1431_vm0, %v1430_v5  ;;  %1224 = vmatprep.mubr.msk.bf16.mxu1 %vm1431_vm0, %v1430_v5 }
   0x6   :  { %97 = vperm.xlu1 %1345, %v65_v3   ;;  %91 = vperm.xlu0 %1344, %v63_v4  }
   0x7   :  { %1195 = vmatpush3.bf16.msra.mxu0 %v84_v10 }
   0xa   :  { %103 = vperm.xlu1 %1345, %v67_v8   ;;  %100 = vperm.xlu0 %1344, %v66_v9  }
   0xb   :  { %17 = vsyncpa [#allocation5], 0  ;;  %v69_v11 = vld [vmem:[%s1949_s0 + $0x38] sm:$0xff]  ;;  %v68_v12 = vld [vmem:[%s1949_s0 + $0x30] sm:$0xff]  ;;  %v85_v15 = vlaneseq  ;;  %vm152_vm3 = vcmask 130048   ;;  %vm266_vm12 = vcmask 261120  }
   0xc   :  { %v71_v13 = vld [vmem:[%s1949_s0 + $0x48] sm:$0xff]  ;;  %v70_v14 = vld [vmem:[%s1949_s0 + $0x40] sm:$0xff]  ;;  %v1628_v46 = vld [vmem:[%s1954_s5 + $0x10] sm:$0xff]   ;;  %vm305_vm13 = vcmask 523264   ;;  %vm464_vm14 = vcmask 1043456  }
   0xd   :  { %v1540_v16 = vand.u32 127, %v85_v15  ;;  %v1615_v44 = vld [vmem:[%s1954_s5] sm:$0xff]   ;;  %v1621_v45 = vld [vmem:[%s1954_s5 + $0x8] sm:$0xff]   ;;  %v1646_v56 = vld [vmem:[%s1954_s5 + $0x18] sm:$0xff]   ;;  %s1432_s5 = smov 32  }
   0xe   :  { %109 = vperm.xlu1 %1345, %v69_v11   ;;  %106 = vperm.xlu0 %1344, %v68_v12   ;;  %v73_v15 = vld [vmem:[%s1950_s1 + $0x8] sm:$0xff] }
   0xf   :  { %1217 = vmatpush3.bf16.msra.mxu1 %v1615_v44 }
  0x10   :  { %1218 = vmatprep.subr.bf16.mxu1 %v1430_v5 }
  0x12   :  { %115 = vperm.xlu1 %1345, %v71_v13   ;;  %112 = vperm.xlu0 %1344, %v70_v14   ;;  %v72_v14 = vld [vmem:[%s1950_s1] sm:$0xff] }
  0x13   :  { %1219 = vmatpush3.bf16.msra.mxu1 %v1621_v45 }
  0x14   :  { %1220 = vmatprep.subr.bf16.mxu1 %v1430_v5 }
  0x17   :  { %1221 = vmatpush3.bf16.msra.mxu1 %v1628_v46 }
  0x18   :  { %1222 = vmatprep.subr.bf16.mxu1 %v1430_v5 }
  0x1b   :  { %1223 = vmatpush3.bf16.msra.mxu1 %v1646_v56 }
  0x1c   :  { %1236 = vmatprep.subr.bf16.mxu1 %v1430_v5 }
  0x81   :  { %v95_v17 = vpop.permute.xlu1 %94  ;;  %v89_v18 = vpop.permute.xlu0 %88 }
  0x82   :  { %vm117_vm1 = vcmp.eq.s32.totalorder %v89_v18, %v1540_v16  ;;  %vm119_vm4 = vcmp.eq.s32.totalorder %v95_v17, %v1540_v16  ;;  %v74_v17 = vld [vmem:[%s1950_s1 + $0x10] sm:$0xff]  ;;  %v75_v18 = vld [vmem:[%s1950_s1 + $0x18] sm:$0xff] }
  0x83   :  { %v1087_v21 = vsel %vm117_vm1, 1.0, %v1430_v5  ;;  %v1089_v26 = vsel %vm119_vm4, 1.0, %v1430_v5 }
  0x85   :  { %v98_v19 = vpop.permute.xlu1 %97  ;;  %v92_v20 = vpop.permute.xlu0 %91 }
  0x86   :  { %vm118_vm2 = vcmp.eq.s32.totalorder %v92_v20, %v1540_v16  ;;  %vm120_vm5 = vcmp.eq.s32.totalorder %v98_v19, %v1540_v16  ;;  %v76_v19 = vld [vmem:[%s1950_s1 + $0x20] sm:$0xff]  ;;  %v77_v20 = vld [vmem:[%s1950_s1 + $0x28] sm:$0xff] }
  0x87   :  { %v1088_v22 = vsel %vm118_vm2, 1.0, %v1430_v5  ;;  %v1090_v27 = vsel %vm120_vm5, 1.0, %v1430_v5  ;;  %vm454_vm2 = vcmask 195584  }
  0x88   :  { %v1546_v23 = vpack.c.bf16 %v1088_v22, %v1087_v21  ;;  %v1564_v32 = vpack.c.bf16 %v1090_v27, %v1089_v26  ;;  %v78_v21 = vld [vmem:[%s1950_s1 + $0x30] sm:$0xff]  ;;  %v79_v22 = vld [vmem:[%s1950_s1 + $0x38] sm:$0xff] }
  0x89   :  { %v104_v24 = vpop.permute.xlu1 %103  ;;  %v101_v25 = vpop.permute.xlu0 %100  ;;  %v82_v26 = vld [vmem:[%s1950_s1 + $0x50] sm:$0xff]  ;;  %v83_v27 = vld [vmem:[%s1950_s1 + $0x58] sm:$0xff] }
  0x8a   :  { %1197 = vmatmul.mubr.msk.bf16.vlgmr.msra.gmra.mrb[0].mxu0 %vm152_vm3, %v1546_v23  ;;  %vm122_vm6 = vcmp.eq.s32.totalorder %v104_v24, %v1540_v16  ;;  %vm121_vm9 = vcmp.eq.s32.totalorder %v101_v25, %v1540_v16  ;;  %v80_v24 = vld [vmem:[%s1950_s1 + $0x40] sm:$0xff]  ;;  %v81_v25 = vld [vmem:[%s1950_s1 + $0x48] sm:$0xff] }
  0x8b   :  { %1200 = vmatprep.mubr.msk.bf16.mxu0 %vm1431_vm0, %v1430_v5  ;;  %v1559_v30 = vsel %vm122_vm6, 1.0, %v1430_v5  ;;  %v1584_v38 = vsel %vm121_vm9, 1.0, %v1430_v5 }
  0x8c   :  { %v1588_v39 = vpack.c.bf16 %v1559_v30, %v1584_v38 }
  0x8d   :  { %v110_v28 = vpop.permute.xlu1 %109  ;;  %v107_v29 = vpop.permute.xlu0 %106 }
  0x8e   :  { %vm123_vm7 = vcmp.eq.s32.totalorder %v107_v29, %v1540_v16  ;;  %vm124_vm8 = vcmp.eq.s32.totalorder %v110_v28, %v1540_v16  ;;  %v1697_v29 = vld [vmem:[%s1953_s4] sm:$0xff] }
  0x8f   :  { %v1562_v31 = vsel %vm123_vm7, 1.0, %v1430_v5  ;;  %v1574_v35 = vsel %vm124_vm8, 1.0, %v1430_v5 }
  0x90   :  { %v371_v33 = vpack.c.bf16 %v1562_v31, %v1559_v30  ;;  %v1596_v41 = vpack.c.bf16 %v1574_v35, %v1562_v31 }
  0x91   :  { %v113_v34 = vpop.permute.xlu0 %112  ;;  %v116_v40 = vpop.permute.xlu1 %115 }
  0x92   :  { %vm125_vm10 = vcmp.eq.s32.totalorder %v113_v34, %v1540_v16  ;;  %1201 = vmatmul.mubr.msk.bf16.gmra.mrb[4].mxu0 %vm152_vm3, %v1564_v32  ;;  %vm126_vm11 = vcmp.eq.s32.totalorder %v116_v40, %v1540_v16  ;;  %v1702_v34 = vld [vmem:[%s1953_s4 + $0x8] sm:$0xff] }
  0x93   :  { %v1577_v36 = vsel %vm125_vm10, 1.0, %v1430_v5  ;;  %1204 = vmatprep.mubr.msk.bf16.mxu0 %vm1431_vm0, %v1430_v5  ;;  %v1604_v42 = vsel %vm126_vm11, 1.0, %v1430_v5 }
  0x94   :  { %v372_v37 = vpack.c.bf16 %v1577_v36, %v1574_v35  ;;  %v1608_v43 = vpack.c.bf16 %v1604_v42, %v1577_v36 }
  0x9a   :  { %1205 = vmatmul.mubr.msk.bf16.gmra.mrb[8].mxu0 %vm152_vm3, %v1588_v39 }
  0x9b   :  { %1208 = vmatprep.mubr.msk.bf16.mxu0 %vm1431_vm0, %v1430_v5 }
  0xa2   :  { %1209 = vmatmul.mubr.msk.bf16.gmra.mrb[12].mxu0 %vm152_vm3, %v1596_v41 }
  0xa3   :  { %1212 = vmatprep.mubr.msk.bf16.mxu0 %vm1431_vm0, %v1430_v5 }
  0xaa   :  { %1213 = vmatmul.mubr.msk.bf16.gmra.mrb[16].mxu0 %vm152_vm3, %v1608_v43 }
 0x15d   :  { %v1633_v47 = vpop.f32.mrb[0].mxu0 }
 0x15e   :  { %v1198_v48 = vpop.f32.mrb[1].mxu0 }
 0x15f   :  { %v1635_v49 = vpop.f32.mrb[2].mxu0 }
 0x160   :  { %v1199_v50 = vpop.f32.mrb[3].mxu0 }
 0x161   :  { %v1707_v50 = vld [vmem:[%s1953_s4 + $0x10] sm:$0xff] }
 0x165   :  { %v1637_v51 = vpop.f32.mrb[4].mxu0 }
 0x166   :  { %v1202_v52 = vpop.f32.mrb[5].mxu0 }
 0x167   :  { %v1639_v53 = vpop.f32.mrb[6].mxu0 }
 0x168   :  { %v1203_v54 = vpop.f32.mrb[7].mxu0 }
 0x16d   :  { %v1641_v55 = vpop.f32.mrb[8].mxu0 }
 0x16e   :  { %v1206_v57 = vpop.f32.mrb[9].mxu0 }
 0x16f   :  { %v221_v58 = vpop.f32.mrb[10].mxu0  ;;  %v452_v57 = vpack.c.bf16 %v1702_v34, %v1697_v29 }
 0x170   :  { %v241_v59 = vmul.f32 %v221_v58, %v1633_v47  ;;  %v1207_v60 = vpop.f32.mrb[11].mxu0 }
 0x175   :  { %v226_v61 = vpop.f32.mrb[12].mxu0 }
 0x176   :  { %v242_v62 = vmul.f32 %v226_v61, %v1635_v49  ;;  %v1210_v63 = vpop.f32.mrb[13].mxu0 }
 0x177   :  { %v229_v0 = vpop.f32.mrb[14].mxu0 }
 0x178   :  { %v1346_v1 = vpack.i.bf16 %v242_v62, %v241_v59  ;;  %v243_v2 = vmul.f32 %v229_v0, %v1637_v51  ;;  %v1211_v3 = vpop.f32.mrb[15].mxu0  ;;  %v453_v59 = vpack.c.bf16 %v1707_v50, %v1707_v50 }
 0x17a   :  { %1347 = vrot.lane.b32.xlu0 %v1346_v1, %s1432_s5 }
 0x17d   :  { %v234_v4 = vpop.f32.mrb[16].mxu0 }
 0x17e   :  { %v244_v8 = vmul.f32 %v234_v4, %v1639_v53  ;;  %v1214_v9 = vpop.f32.mrb[17].mxu0 }
 0x17f   :  { %v237_v10 = vpop.f32.mrb[18].mxu0 }
 0x180   :  { %v1351_v11 = vpack.i.bf16 %v244_v8, %v243_v2  ;;  %v245_v12 = vmul.f32 %v237_v10, %v1641_v55  ;;  %v1215_v13 = vpop.f32.mrb[19].mxu0 }
 0x182   :  { %1352 = vrot.lane.b32.xlu1 %v1351_v11, %s1432_s5  ;;  %259 = vrot.lane.b32.xlu0 %v245_v12, %s1432_s5 }
 0x186   :  { %378 = vperm.xlu1 %1345, %v72_v14   ;;  %381 = vperm.xlu0 %1344, %v73_v15  }
 0x18a   :  { %384 = vperm.xlu1 %1345, %v74_v17   ;;  %387 = vperm.xlu0 %1344, %v75_v18  }
 0x18e   :  { %390 = vperm.xlu1 %1345, %v76_v19   ;;  %393 = vperm.xlu0 %1344, %v77_v20  }
 0x192   :  { %417 = vperm.xlu1 %1345, %v78_v21   ;;  %420 = vperm.xlu0 %1344, %v79_v22  }
 0x196   :  { %423 = vperm.xlu1 %1345, %v80_v24   ;;  %426 = vperm.xlu0 %1344, %v81_v25  }
 0x19a   :  { %429 = vperm.xlu1 %1345, %v82_v26   ;;  %432 = vperm.xlu0 %1344, %v83_v27  }
 0x1ec   :  { %v1348_v28 = vpop.permute.xlu0 %1347 }
 0x1ed   :  { %v1350_v40 = vunpack.i.h.bf16 %v1348_v28  ;;  %v1349_v48 = vunpack.i.l.bf16 %v1348_v28 }
 0x1ef   :  { %v268_v52 = vsel %vm266_vm12, %v1635_v49, %v1350_v40  ;;  %v267_v54 = vsel %vm266_vm12, %v1633_v47, %v1349_v48  ;;  %v466_v47 = vsel %vm464_vm14, %v453_v59, 0 }
 0x1f0   :  { %v272_v58 = vpack.c.bf16 %v268_v52, %v267_v54 }
 0x1f2   :  { %1225 = vmatmul.mubr.msk.bf16.vlgmr.msra.gmra.mrb[0].mxu1 %vm305_vm13, %v272_v58 }
 0x1f3   :  { %1228 = vmatprep.mubr.msk.bf16.mxu1 %vm1431_vm0, %v1430_v5  ;;  %1237 = vmatpush3.bf16.msra.mxu1 %v452_v57 }
 0x1f4   :  { %v1353_v60 = vpop.permute.xlu1 %1352  ;;  %1238 = vmatprep.subr.bf16.mxu1 %v1430_v5  ;;  %v260_v1 = vpop.permute.xlu0 %259 }
 0x1f5   :  { %v1355_v49 = vunpack.i.h.bf16 %v1353_v60  ;;  %v1354_v61 = vunpack.i.l.bf16 %v1353_v60  ;;  %v271_v2 = vsel %vm266_vm12, %v1641_v55, %v260_v1 }
 0x1f6   :  { %v274_v3 = vpack.c.bf16 %v271_v2, %v271_v2 }
 0x1f7   :  { %v270_v62 = vsel %vm266_vm12, %v1639_v53, %v1355_v49  ;;  %v269_v63 = vsel %vm266_vm12, %v1637_v51, %v1354_v61  ;;  %1239 = vmatpush3.bf16.msra.mxu1 %v466_v47 }
 0x1f8   :  { %v273_v0 = vpack.c.bf16 %v270_v62, %v269_v63  ;;  %1274 = vmatprep.subr.bf16.mxu1 %v1430_v5 }
 0x1fa   :  { %1229 = vmatmul.mubr.msk.bf16.gmra.mrb[4].mxu1 %vm305_vm13, %v273_v0 }
 0x1fb   :  { %1232 = vmatprep.mubr.msk.bf16.mxu1 %vm1431_vm0, %v1430_v5 }
 0x202   :  { %1233 = vmatmul.mubr.msk.bf16.gmra.mrb[8].mxu1 %vm305_vm13, %v274_v3 }
 0x203   :  { %1240 = vmatprep.mubr.msk.bf16.mxu1 %vm1431_vm0, %v1430_v5 }
 0x205   :  { %v379_v51 = vpop.permute.xlu1 %378  ;;  %v382_v53 = vpop.permute.xlu0 %381 }
 0x206   :  { %vm395_vm15 = vcmp.eq.s32.totalorder %v379_v51, %v1540_v16  ;;  %vm396_vm1 = vcmp.eq.s32.totalorder %v382_v53, %v1540_v16 }
 0x207   :  { %v1110_v4 = vsel %vm395_vm15, 1.0, %v1430_v5  ;;  %v1111_v8 = vsel %vm396_vm1, 1.0, %v1430_v5 }
 0x208   :  { %v413_v9 = vpack.c.bf16 %v1111_v8, %v1110_v4 }
 0x209   :  { %v385_v10 = vpop.permute.xlu1 %384  ;;  %v388_v55 = vpop.permute.xlu0 %387 }
 0x20a   :  { %vm397_vm4 = vcmp.eq.s32.totalorder %v385_v10, %v1540_v16  ;;  %vm398_vm5 = vcmp.eq.s32.totalorder %v388_v55, %v1540_v16  ;;  %1241 = vmatmul.mubr.msk.bf16.vlgmr.msra.gmra.mrb[12].mxu1 %vm454_vm2, %v413_v9 }
 0x20b   :  { %1244 = vmatprep.mubr.msk.bf16.mxu1 %vm1431_vm0, %v1430_v5  ;;  %v1112_v11 = vsel %vm397_vm4, 1.0, %v1430_v5  ;;  %v1113_v12 = vsel %vm398_vm5, 1.0, %v1430_v5 }
 0x20c   :  { %v414_v15 = vpack.c.bf16 %v1113_v12, %v1112_v11 }
 0x20d   :  { %v391_v13 = vpop.permute.xlu1 %390  ;;  %v394_v14 = vpop.permute.xlu0 %393 }
 0x20e   :  { %vm399_vm6 = vcmp.eq.s32.totalorder %v391_v13, %v1540_v16  ;;  %vm400_vm7 = vcmp.eq.s32.totalorder %v394_v14, %v1540_v16 }
 0x20f   :  { %v1114_v24 = vsel %vm399_vm6, 1.0, %v1430_v5  ;;  %v1115_v25 = vsel %vm400_vm7, 1.0, %v1430_v5 }
 0x210   :  { %v415_v52 = vpack.c.bf16 %v1115_v25, %v1114_v24 }
 0x211   :  { %v418_v17 = vpop.permute.xlu1 %417  ;;  %v421_v18 = vpop.permute.xlu0 %420 }
 0x212   :  { %vm434_vm8 = vcmp.eq.s32.totalorder %v418_v17, %v1540_v16  ;;  %vm435_vm9 = vcmp.eq.s32.totalorder %v421_v18, %v1540_v16  ;;  %1245 = vmatmul.mubr.msk.bf16.gmra.mrb[16].mxu1 %vm454_vm2, %v414_v15 }
 0x213   :  { %v1116_v19 = vsel %vm434_vm8, 1.0, %v1430_v5  ;;  %v1117_v20 = vsel %vm435_vm9, 1.0, %v1430_v5  ;;  %1248 = vmatprep.mubr.msk.bf16.mxu1 %vm1431_vm0, %v1430_v5 }
 0x214   :  { %v525_v21 = vsel %vm454_vm2, %v1116_v19, 0.0  ;;  %v526_v22 = vsel %vm454_vm2, %v1117_v20, 0.0 }
 0x215   :  { %v424_v26 = vpop.permute.xlu1 %423  ;;  %v427_v27 = vpop.permute.xlu0 %426  ;;  %v527_v28 = vadd.f32 %v526_v22, %v525_v21  ;;  %v1356_v21 = vpack.i.bf16 %v1702_v34, %v1697_v29 }
 0x216   :  { %vm436_vm10 = vcmp.eq.s32.totalorder %v424_v26, %v1540_v16  ;;  %vm437_vm11 = vcmp.eq.s32.totalorder %v427_v27, %v1540_v16 }
 0x217   :  { %v1118_v40 = vsel %vm436_vm10, 1.0, %v1430_v5  ;;  %v1119_v48 = vsel %vm437_vm11, 1.0, %v1430_v5  ;;  %1357 = vrot.lane.b32.xlu0 %v1356_v21, %s1432_s5 }
 0x218   :  { %v528_v54 = vsel %vm454_vm2, %v1118_v40, 0.0  ;;  %v530_v60 = vsel %vm454_vm2, %v1119_v48, 0.0 }
 0x219   :  { %v529_v57 = vadd.f32 %v528_v54, %v527_v28  ;;  %v430_v58 = vpop.permute.xlu1 %429  ;;  %v433_v59 = vpop.permute.xlu0 %432 }
 0x21a   :  { %vm438_vm15 = vcmp.eq.s32.totalorder %v430_v58, %v1540_v16  ;;  %vm439_vm1 = vcmp.eq.s32.totalorder %v433_v59, %v1540_v16  ;;  %1249 = vmatmul.mubr.msk.bf16.gmra.mrb[20].mxu1 %vm454_vm2, %v415_v52 }
 0x21b   :  { %v531_v47 = vadd.f32 %v530_v60, %v529_v57  ;;  %v1120_v49 = vsel %vm438_vm15, 1.0, %v1430_v5  ;;  %v1121_v61 = vsel %vm439_vm1, 1.0, %v1430_v5  ;;  %1280 = vmatprep.mubr.msk.bf16.mxu1 %vm1431_vm0, %v1430_v5  ;;  %635 = vrot.lane.b32.xlu0 %v1707_v50, %s1432_s5 }
 0x21c   :  { %v532_v62 = vsel %vm454_vm2, %v1120_v49, 0.0  ;;  %v534_v0 = vsel %vm454_vm2, %v1121_v61, 0.0  ;;  %vm573_vm2 = vcmask 392192  }
 0x21d   :  { %v533_v63 = vadd.f32 %v532_v62, %v531_v47 }
 0x21f   :  { %v535_v1 = vadd.f32 %v534_v0, %v533_v63 }
 0x221   :  { %v536_v2 = vrot.slane %v535_v1, 4 }
 0x223   :  { %v537_v3 = vadd.f32 %v536_v2, %v535_v1 }
 0x225   :  { %v538_v51 = vrot.slane %v537_v3, 2 }
 0x227   :  { %v539_v16 = vadd.f32 %v538_v51, %v537_v3 }
 0x229   :  { %v540_v53 = vrot.slane %v539_v16, 1 }
 0x22b   :  { %v541_v4 = vadd.f32 %v540_v53, %v539_v16 }
 0x22d   :  { %1379 = vrcp.f32 %v541_v4  ;;  %vm542_vm4 = vcmp.gt.f32.partialorder %v541_v4, 0.0 }
 0x237   :  { %v1380_v8 = vpop.eup %1379 }
 0x238   :  { %v544_v9 = vsel %vm542_vm4, %v1380_v8, 0.0 }
 0x239   :  { %v545_v10 = vmul.f32 %v1116_v19, %v544_v9  ;;  %v546_v55 = vmul.f32 %v1117_v20, %v544_v9  ;;  %v547_v12 = vmul.f32 %v1118_v40, %v544_v9  ;;  %v548_v13 = vmul.f32 %v1119_v48, %v544_v9  ;;  %v1783_v20 = vld [vmem:[%s1955_s6] ss:$0 sm:$0xff] }
 0x23a   :  { %v549_v14 = vmul.f32 %v1120_v49, %v544_v9  ;;  %v550_v15 = vmul.f32 %v1121_v61, %v544_v9 }
 0x23b   :  { %v551_v11 = vpack.c.bf16 %v546_v55, %v545_v10  ;;  %v552_v17 = vpack.c.bf16 %v548_v13, %v547_v12  ;;  %v1375_v13 = vld [vmem:[%s1956_s7] sm:$0xff]  }
 0x23c   :  { %v553_v18 = vpack.c.bf16 %v550_v15, %v549_v14  ;;  %v1376_v15 = vld [vmem:[%s1956_s7 + $0x8] sm:$0xff]  }
 0x23d   :  { %557 = vxpose.xlu1.c.b16.start [1/3] (short) (narrow) %v551_v11, 32 }
 0x241   :  { %558 = vxpose.xlu1.c.b16.cont [2/3] (short) (narrow) %v552_v17, 32  ;;  %v1377_v17 = vld [vmem:[%s1956_s7 + $0x10] sm:$0xff]  }
 0x245   :  { %559 = vxpose.xlu1.c.b16.end [3/3] (short) (narrow) %v553_v18, 32  ;;  %v1378_v18 = vld [vmem:[%s1956_s7 + $0x18] sm:$0xff]  }
 0x289   :  { %v1358_v21 = vpop.permute.xlu0 %1357 }
 0x2a3   :  { %v565_v19 = vpop.trf.xlu1 }
 0x2a4   :  { %1258 = vmatprep.mubr.msk.bf16.mxu0 %vm573_vm2, %v565_v19  ;;  %v1360_v19 = vunpack.i.h.bf16 %v1358_v21 }
 0x2a7   :  { %v566_v14 = vpop.trf.xlu1 }
 0x2c5   :  { %v349_v22 = vpop.f32.mrb[0].mxu1 }
 0x2c6   :  { %v1226_v24 = vpop.f32.mrb[1].mxu1  ;;  %v350_v26 = vadd.f32 %v1783_v20, %v349_v22  ;;  %v1359_v22 = vunpack.i.l.bf16 %v1358_v21 }
 0x2c7   :  { %v352_v25 = vpop.f32.mrb[2].mxu1 }
 0x2c8   :  { %v353_v29 = vadd.f32 %v1783_v20, %v352_v25  ;;  %v1227_v34 = vpop.f32.mrb[3].mxu1  ;;  %v636_v25 = vpop.permute.xlu0 %635 }
 0x2c9   :  { %v1811_v34 = vld [vmem:[%s1951_s2] sm:$0xff] }
 0x2ca   :  { %v374_v27 = vpack.c.bf16 %v353_v29, %v350_v26 }
 0x2cc   :  { %1275 = vmatpush3.bf16.msra.mxu1 %v374_v27  ;;  %v1816_v27 = vld [vmem:[%s1951_s2 + $0x8] sm:$0xff] }
 0x2cd   :  { %v357_v50 = vpop.f32.mrb[4].mxu1  ;;  %1276 = vmatprep.subr.bf16.mxu1 %v1430_v5 }
 0x2ce   :  { %v1230_v28 = vpop.f32.mrb[5].mxu1  ;;  %v358_v48 = vadd.f32 %v1783_v20, %v357_v50 }
 0x2cf   :  { %v360_v40 = vpop.f32.mrb[6].mxu1 }
 0x2d0   :  { %v361_v52 = vadd.f32 %v1783_v20, %v360_v40  ;;  %v1231_v54 = vpop.f32.mrb[7].mxu1 }
 0x2d1   :  { %v804_v54 = vpack.c.bf16 %v1816_v27, %v1811_v34 }
 0x2d2   :  { %v375_v57 = vpack.c.bf16 %v361_v52, %v358_v48 }
 0x2d4   :  { %1277 = vmatpush3.bf16.msra.mxu1 %v375_v57 }
 0x2d5   :  { %v365_v58 = vpop.f32.mrb[8].mxu1  ;;  %1278 = vmatprep.subr.bf16.mxu1 %v1430_v5 }
 0x2d6   :  { %v366_v59 = vadd.f32 %v1783_v20, %v365_v58  ;;  %v1234_v60 = vpop.f32.mrb[9].mxu1 }
 0x2d7   :  { %v368_v47 = vpop.f32.mrb[10].mxu1 }
 0x2d8   :  { %v376_v49 = vpack.c.bf16 %v366_v59, %v366_v59  ;;  %v1235_v61 = vpop.f32.mrb[11].mxu1 }
 0x2da   :  { %v749_v62 = vsel %vm464_vm14, %v376_v49, 0 }
 0x2db   :  { %1279 = vmatpush3.bf16.msra.mxu1 %v749_v62 }
 0x2dc   :  { %1306 = vmatprep.subr.bf16.mxu1 %v1430_v5 }
 0x2dd   :  { %v502_v63 = vpop.f32.mrb[12].mxu1 }
 0x2de   :  { %v1242_v0 = vpop.f32.mrb[13].mxu1 }
 0x2df   :  { %v505_v1 = vpop.f32.mrb[14].mxu1 }
 0x2e0   :  { %v554_v2 = vpack.c.bf16 %v505_v1, %v502_v63  ;;  %v1243_v3 = vpop.f32.mrb[15].mxu1 }
 0x2e2   :  { %1252 = vmatprep.subr.bf16.mxu0 %v554_v2 }
 0x2e3   :  { %1253 = vmatpush3.bf16.msra.mxu0 %v554_v2 }
 0x2e5   :  { %v510_v51 = vpop.f32.mrb[16].mxu1 }
 0x2e6   :  { %v1246_v16 = vpop.f32.mrb[17].mxu1 }
 0x2e7   :  { %v513_v53 = vpop.f32.mrb[18].mxu1 }
 0x2e8   :  { %v555_v4 = vpack.c.bf16 %v513_v53, %v510_v51  ;;  %v1247_v8 = vpop.f32.mrb[19].mxu1 }
 0x2ea   :  { %1254 = vmatprep.subr.bf16.mxu0 %v555_v4 }
 0x2eb   :  { %1255 = vmatpush3.bf16.msra.mxu0 %v555_v4 }
 0x2ed   :  { %v518_v9 = vpop.f32.mrb[20].mxu1 }
 0x2ee   :  { %v1250_v10 = vpop.f32.mrb[21].mxu1 }
 0x2ef   :  { %v521_v55 = vpop.f32.mrb[22].mxu1 }
 0x2f0   :  { %v556_v11 = vpack.c.bf16 %v521_v55, %v518_v9  ;;  %v1251_v12 = vpop.f32.mrb[23].mxu1 }
 0x2f2   :  { %1256 = vmatprep.subr.bf16.mxu0 %v556_v11 }
 0x2f3   :  { %1257 = vmatpush3.bf16.msra.mxu0 %v556_v11 }
 0x2f4   :  { %1262 = vmatprep.subr.bf16.mxu0 %v1375_v13 }
 0x2f6   :  { %1259 = vmatmul.mubr.msk.bf16.vlgmr.msra.gmra.mrb[20].mxu0 %vm573_vm2, %v566_v14 }
 0x2f7   :  { %1263 = vmatpush3.bf16.msra.mxu0 %v1375_v13 }
 0x2f8   :  { %1264 = vmatprep.subr.bf16.mxu0 %v1376_v15 }
 0x2fb   :  { %1265 = vmatpush3.bf16.msra.mxu0 %v1376_v15 }
 0x2fc   :  { %1266 = vmatprep.subr.bf16.mxu0 %v1377_v17 }
 0x2ff   :  { %1267 = vmatpush3.bf16.msra.mxu0 %v1377_v17 }
 0x300   :  { %1268 = vmatprep.subr.bf16.mxu0 %v1378_v18 }
 0x303   :  { %1269 = vmatpush3.bf16.msra.mxu0 %v1378_v18 }
 0x304   :  { %1284 = vmatprep.subr.bf16.mxu0 %v1430_v5 }
 0x3c9   :  { %v1260_v24 = vpop.f32.mrb[20].mxu0 }
 0x3ca   :  { %v614_v26 = vpop.f32.mrb[21].mxu0  ;;  %v642_v28 = vsel %vm266_vm12, %v1260_v24, %v636_v25 }
 0x3cb   :  { %v1261_v29 = vpop.f32.mrb[22].mxu0  ;;  %v640_v40 = vsel %vm266_vm12, %v614_v26, %v1359_v22  ;;  %v644_v57 = vpack.c.bf16 %v642_v28, %v642_v28  ;;  %v976_v22 = vpack.c.bf16 %v1584_v38, %v1584_v38 }
 0x3cc   :  { %v617_v50 = vpop.f32.mrb[23].mxu0 }
 0x3cd   :  { %v641_v48 = vsel %vm266_vm12, %v617_v50, %v1360_v19  ;;  %v373_v19 = vpack.c.bf16 %v1604_v42, %v1604_v42 }
 0x3ce   :  { %v643_v52 = vpack.c.bf16 %v641_v48, %v640_v40 }
 0x3d0   :  { %1270 = vmatprep.mubr.msk.bf16.mxu0 %vm305_vm13, %v643_v52 }
 0x3d1   :  { %1271 = vmatmul.mubr.msk.bf16.vlgmr.msra.gmra.mrb[24].mxu0 %vm305_vm13, %v644_v57 }
 0x3d2   :  { %1285 = vmatpush3.bf16.msra.mxu0 %v804_v54  ;;  %1286 = vmatprep.mubr.msk.bf16.mxu0 %vm1431_vm0, %v1430_v5 }
 0x3d9   :  { %1287 = vmatmul.mubr.msk.bf16.vlgmr.msra.gmra.mrb[28].mxu0 %vm152_vm3, %v1546_v23 }
 0x3da   :  { %1290 = vmatprep.mubr.msk.bf16.mxu0 %vm1431_vm0, %v1430_v5 }
 0x3e1   :  { %1291 = vmatmul.mubr.msk.bf16.gmra.mrb[32].mxu0 %vm152_vm3, %v1564_v32 }
 0x3e2   :  { %1294 = vmatprep.mubr.msk.bf16.mxu0 %vm1431_vm0, %v1430_v5 }
 0x3e9   :  { %1295 = vmatmul.mubr.msk.bf16.gmra.mrb[36].mxu0 %vm152_vm3, %v1588_v39 }
 0x3ea   :  { %1298 = vmatprep.mubr.msk.bf16.mxu0 %vm1431_vm0, %v1430_v5 }
 0x3f1   :  { %1299 = vmatmul.mubr.msk.bf16.gmra.mrb[40].mxu0 %vm152_vm3, %v1596_v41 }
 0x3f2   :  { %1302 = vmatprep.mubr.msk.bf16.mxu0 %vm1431_vm0, %v1430_v5 }
 0x3f9   :  { %1303 = vmatmul.mubr.msk.bf16.gmra.mrb[44].mxu0 %vm152_vm3, %v1608_v43  ;;  %vm744_vm3 = vcmask 326656  }
 0x4a4   :  { %v1272_v58 = vpop.f32.mrb[24].mxu0 }
 0x4a5   :  { %v1845_v59 = vpop.f32.mrb[25].mxu0 }
 0x4a6   :  { %v1273_v60 = vpop.f32.mrb[26].mxu0 }
 0x4a7   :  { %v1847_v47 = vpop.f32.mrb[27].mxu0 }
 0x4ac   :  { %v839_v49 = vpop.f32.mrb[28].mxu0 }
 0x4ad   :  { %v1288_v39 = vpop.f32.mrb[29].mxu0 }
 0x4ae   :  { %v842_v61 = vpop.f32.mrb[30].mxu0 }
 0x4af   :  { %v1289_v62 = vpop.f32.mrb[31].mxu0 }
 0x4b4   :  { %v847_v63 = vpop.f32.mrb[32].mxu0 }
 0x4b5   :  { %v1292_v0 = vpop.f32.mrb[33].mxu0 }
 0x4b6   :  { %v850_v1 = vpop.f32.mrb[34].mxu0 }
 0x4b7   :  { %v1293_v41 = vpop.f32.mrb[35].mxu0 }
 0x4bc   :  { %v855_v2 = vpop.f32.mrb[36].mxu0 }
 0x4bd   :  { %v1296_v3 = vpop.f32.mrb[37].mxu0 }
 0x4be   :  { %v858_v51 = vpop.f32.mrb[38].mxu0 }
 0x4bf   :  { %v878_v16 = vmul.f32 %v858_v51, %v839_v49  ;;  %v1297_v53 = vpop.f32.mrb[39].mxu0 }
 0x4c4   :  { %v863_v43 = vpop.f32.mrb[40].mxu0 }
 0x4c5   :  { %v879_v4 = vmul.f32 %v863_v43, %v842_v61  ;;  %v1300_v8 = vpop.f32.mrb[41].mxu0 }
 0x4c6   :  { %v866_v9 = vpop.f32.mrb[42].mxu0 }
 0x4c7   :  { %v1361_v10 = vpack.i.bf16 %v879_v4, %v878_v16  ;;  %v880_v55 = vmul.f32 %v866_v9, %v847_v63  ;;  %v1301_v11 = vpop.f32.mrb[43].mxu0 }
 0x4c9   :  { %1362 = vrot.lane.b32.xlu0 %v1361_v10, %s1432_s5 }
 0x4cc   :  { %v871_v12 = vpop.f32.mrb[44].mxu0 }
 0x4cd   :  { %v881_v13 = vmul.f32 %v871_v12, %v850_v1  ;;  %v1304_v14 = vpop.f32.mrb[45].mxu0 }
 0x4ce   :  { %v874_v15 = vpop.f32.mrb[46].mxu0 }
 0x4cf   :  { %v1366_v17 = vpack.i.bf16 %v881_v13, %v880_v55  ;;  %v882_v18 = vmul.f32 %v874_v15, %v855_v2  ;;  %v1305_v21 = vpop.f32.mrb[47].mxu0 }
 0x4d1   :  { %1367 = vrot.lane.b32.xlu1 %v1366_v17, %s1432_s5 }
 0x4d5   :  { %896 = vrot.lane.b32.xlu1 %v882_v18, %s1432_s5 }
 0x4e7   :  { %728 = vxpose.xlu0.c.b16.start [1/3] (short) (narrow) %v371_v33, 16 }
 0x4eb   :  { %729 = vxpose.xlu0.c.b16.cont [2/3] (short) (narrow) %v372_v37, 16 }
 0x4ef   :  { %730 = vxpose.xlu0.c.b16.end [3/3] (short) (narrow) %v373_v19, 16 }
 0x4f8   :  { %980 = vxpose.xlu1.c.b16.start [1/3] (short) (narrow) %v1546_v23, 16 }
 0x4fc   :  { %981 = vxpose.xlu1.c.b16.cont [2/3] (short) (narrow) %v1564_v32, 16 }
 0x500   :  { %982 = vxpose.xlu1.c.b16.end [3/3] (short) (narrow) %v976_v22, 16 }
 0x53b   :  { %v1363_v24 = vpop.permute.xlu0 %1362 }
 0x53c   :  { %v1365_v25 = vunpack.i.h.bf16 %v1363_v24  ;;  %v1364_v30 = vunpack.i.l.bf16 %v1363_v24 }
 0x53e   :  { %v904_v31 = vsel %vm266_vm12, %v863_v43, %v1365_v25  ;;  %v903_v33 = vsel %vm266_vm12, %v858_v51, %v1364_v30 }
 0x53f   :  { %v908_v35 = vpack.c.bf16 %v904_v31, %v903_v33 }
 0x543   :  { %v1368_v36 = vpop.permute.xlu1 %1367 }
 0x544   :  { %v1370_v37 = vunpack.i.h.bf16 %v1368_v36  ;;  %v1369_v42 = vunpack.i.l.bf16 %v1368_v36 }
 0x546   :  { %v906_v26 = vsel %vm266_vm12, %v871_v12, %v1370_v37  ;;  %v905_v23 = vsel %vm266_vm12, %v866_v9, %v1369_v42 }
 0x547   :  { %v909_v32 = vpack.c.bf16 %v906_v26, %v905_v23  ;;  %v897_v38 = vpop.permute.xlu1 %896 }
 0x54d   :  { %v736_v29 = vpop.trf.xlu0 }
 0x54e   :  { %1281 = vmatmul.mubr.msk.bf16.vlgmr.msra.gmra.mrb[24].mxu1 %vm744_vm3, %v736_v29 }
 0x54f   :  { %1307 = vmatpush3.bf16.msra.mxu1 %v1615_v44  ;;  %1314 = vmatprep.mubr.msk.bf16.mxu1 %vm1431_vm0, %v1430_v5  ;;  %v907_v44 = vsel %vm266_vm12, %v874_v15, %v897_v38 }
 0x550   :  { %1308 = vmatprep.subr.bf16.mxu1 %v1430_v5 }
 0x553   :  { %1309 = vmatpush3.bf16.msra.mxu1 %v1621_v45  ;;  %v910_v45 = vpack.c.bf16 %v907_v44, %v907_v44 }
 0x554   :  { %1310 = vmatprep.subr.bf16.mxu1 %v1430_v5 }
 0x557   :  { %1311 = vmatpush3.bf16.msra.mxu1 %v1628_v46  ;;  %v1127_v46 = vld [vmem:[%s1957_s8] ss:$0 sm:$0xff]  ;;  %s1433_s8 = smov [#allocation4]  }
 0x558   :  { %1312 = vmatprep.subr.bf16.mxu1 %v1430_v5  ;;  %v719_v28 = vadd.f32 %v1127_v46, %v1847_v47  ;;  %s1072_s20 = sshll.u32 %s1433_s8, 4  ;;  %s1073_s20 = int_to_ptr.vmem [resolvable:$true] %s1072_s20 }
 0x559   :  { %s1381_s21 = scalar_lea.vmem %s1073_s20, 256  ;;  %p1386_p1 = scmp.lt.s32.totalorder %s1073_s20, %s1073_s20 }
 0x55a   :  { %p1382_p0 = scmp.ne.s32.totalorder %s1073_s20, %s1381_s21  ;;  %p1387_p2 = scmp.lt.s32.totalorder %s1381_s21, %s1381_s21 }
 0x55b   :  { %1313 = vmatpush3.bf16.msra.mxu1 %v1646_v56  ;;  %v716_v56 = vadd.f32 %v1127_v46, %v1845_v59 }
 0x55c   :  { %1326 = vmatprep.subr.bf16.mxu1 %v1430_v5  ;;  %p1388_p3 = por %p1387_p2, %p1386_p1 }
 0x55e   :  { %1315 = vmatmul.mubr.msk.bf16.vlgmr.msra.gmra.mrb[28].mxu1 %vm305_vm13, %v908_v35  ;;  %v988_v10 = vpop.trf.xlu1  ;;  %p1389_p4 = pnand %p1388_p3, %p1382_p0 }
 0x55f   :  { %1318 = vmatprep.mubr.msk.bf16.mxu1 %vm1431_vm0, %v1430_v5 }
 0x566   :  { %1319 = vmatmul.mubr.msk.bf16.gmra.mrb[32].mxu1 %vm305_vm13, %v909_v32 }
 0x567   :  { %1322 = vmatprep.mubr.msk.bf16.mxu1 %vm1431_vm0, %v1430_v5 }
 0x56e   :  { %1323 = vmatmul.mubr.msk.bf16.gmra.mrb[36].mxu1 %vm305_vm13, %v910_v45 }
 0x56f   :  { %1332 = vmatprep.mubr.msk.bf16.mxu1 %vm1431_vm0, %v1430_v5 }
 0x621   :  { %v785_v50 = vpop.f32.mrb[24].mxu1 }
 0x622   :  { %v786_v40 = vadd.f32 %v785_v50, %v716_v56  ;;  %v1282_v48 = vpop.f32.mrb[25].mxu1 }
 0x623   :  { %v788_v52 = vpop.f32.mrb[26].mxu1 }
 0x624   :  { %v789_v54 = vadd.f32 %v788_v52, %v719_v28  ;;  %794 = vrot.lane.b32.xlu0 %v786_v40, %s1432_s5  ;;  %v1283_v57 = vpop.f32.mrb[27].mxu1 }
 0x628   :  { %796 = vrot.lane.b32.xlu0 %v789_v54, %s1432_s5 }
 0x631   :  { %v954_v58 = vpop.f32.mrb[28].mxu1 }
 0x632   :  { %v1316_v60 = vpop.f32.mrb[29].mxu1  ;;  %v955_v39 = vadd.f32 %v1783_v20, %v954_v58 }
 0x633   :  { %v957_v49 = vpop.f32.mrb[30].mxu1 }
 0x634   :  { %v958_v61 = vadd.f32 %v1783_v20, %v957_v49  ;;  %v1317_v59 = vpop.f32.mrb[31].mxu1 }
 0x636   :  { %v977_v62 = vpack.c.bf16 %v958_v61, %v955_v39 }
 0x638   :  { %1327 = vmatpush3.bf16.msra.mxu1 %v977_v62 }
 0x639   :  { %v962_v47 = vpop.f32.mrb[32].mxu1  ;;  %1328 = vmatprep.subr.bf16.mxu1 %v1430_v5 }
 0x63a   :  { %v1320_v63 = vpop.f32.mrb[33].mxu1  ;;  %v963_v1 = vadd.f32 %v1783_v20, %v962_v47 }
 0x63b   :  { %v965_v0 = vpop.f32.mrb[34].mxu1 }
 0x63c   :  { %v966_v41 = vadd.f32 %v1783_v20, %v965_v0  ;;  %v1321_v2 = vpop.f32.mrb[35].mxu1 }
 0x63e   :  { %v978_v3 = vpack.c.bf16 %v966_v41, %v963_v1 }
 0x640   :  { %1329 = vmatpush3.bf16.msra.mxu1 %v978_v3 }
 0x641   :  { %v970_v51 = vpop.f32.mrb[36].mxu1  ;;  %1330 = vmatprep.subr.bf16.mxu1 %v1430_v5 }
 0x642   :  { %v971_v16 = vadd.f32 %v1783_v20, %v970_v51  ;;  %v1324_v53 = vpop.f32.mrb[37].mxu1 }
 0x643   :  { %v973_v43 = vpop.f32.mrb[38].mxu1 }
 0x644   :  { %v979_v4 = vpack.c.bf16 %v971_v16, %v971_v16  ;;  %v1325_v8 = vpop.f32.mrb[39].mxu1 }
 0x646   :  { %v1000_v9 = vsel %vm464_vm14, %v979_v4, 0 }
 0x647   :  { %1331 = vmatpush3.bf16.msra.mxu1 %v1000_v9 }
 0x64a   :  { %1333 = vmatmul.mubr.msk.bf16.vlgmr.msra.gmra.mrb[40].mxu1 %vm744_vm3, %v988_v10 }
 0x696   :  { %v795_v55 = vpop.permute.xlu0 %794 }
 0x697   :  { %v800_v11 = vsel %vm266_vm12, %v1509_v6, %v795_v55 }
 0x698   :  { %802 = vst.msk [vmem:[#allocation4] sm:$0xff] %vm305_vm13, %v800_v11 }
 0x69a   :  { %v797_v12 = vpop.permute.xlu0 %796 }
 0x69b   :  { %v801_v5 = vsel %vm266_vm12, %v1514_v7, %v797_v12 }
 0x69c   :  { %803 = vst.msk [vmem:[#allocation4 + $0x8] sm:$0xff] %vm305_vm13, %v801_v5 }
 0x69d   :  { %1392 = shalt.err (!%p1389_p4)
}
 0x69e   :  { %s1393_s24 = scalar_lea.hbm %s1959_s10, 256 }
 0x69f   :  { %p1394_p5 = scmp.ne.s32.totalorder %s1959_s10, %s1393_s24  ;;  %p1397_p6 = scmp.lt.u32.totalorder %s1393_s24, %s1959_s10 }
 0x6a1   :  { %p1399_p7 = pnand %p1397_p6, %p1394_p5 }
 0x6a3   :  { %1402 = shalt.err (!%p1399_p7)
}
 0x6a4   :  { %s1434_s3 = smov 128   ;;  %s1435_s29 = smov 8  }
 0x6a5   :  { %1078 = dma.vmem_to_hbm [thread:$0]  %s1073_s20, 256, %s1959_s10, [#allocation5], %s1434_s3, %s1434_s3, %s1435_s29  }
 0x6a6   :  { %s1436_s6 = smov [#allocation2]  }
 0x6a7   :  { %s1060_s30 = sshll.u32 %s1436_s6, 4  ;;  %s1061_s30 = int_to_ptr.vmem [resolvable:$true] %s1060_s30 }
 0x6a8   :  { %s1403_s10 = scalar_lea.vmem %s1061_s30, 256  ;;  %p1408_p9 = scmp.lt.s32.totalorder %s1061_s30, %s1061_s30 }
 0x6a9   :  { %p1404_p8 = scmp.ne.s32.totalorder %s1061_s30, %s1403_s10  ;;  %p1409_p10 = scmp.lt.s32.totalorder %s1403_s10, %s1403_s10 }
 0x6ab   :  { %p1410_p11 = por %p1409_p10, %p1408_p9 }
 0x6ad   :  { %p1411_p12 = pnand %p1410_p11, %p1404_p8 }
 0x71d   :  { %v1036_v6 = vpop.f32.mrb[40].mxu1 }
 0x71e   :  { %1045 = vrot.lane.b32.xlu0 %v1036_v6, %s1432_s5  ;;  %v1334_v7 = vpop.f32.mrb[41].mxu1 }
 0x71f   :  { %v1039_v20 = vpop.f32.mrb[42].mxu1 }
 0x720   :  { %v1335_v13 = vpop.f32.mrb[43].mxu1 }
 0x722   :  { %1047 = vrot.lane.b32.xlu0 %v1039_v20, %s1432_s5 }
 0x790   :  { %v1046_v14 = vpop.permute.xlu0 %1045 }
 0x791   :  { %v1051_v15 = vsel %vm266_vm12, %v1811_v34, %v1046_v14 }
 0x792   :  { %1053 = vst.msk [vmem:[#allocation2] sm:$0xff] %vm305_vm13, %v1051_v15 }
 0x794   :  { %v1048_v17 = vpop.permute.xlu0 %1047 }
 0x795   :  { %v1052_v18 = vsel %vm266_vm12, %v1816_v27, %v1048_v17 }
 0x796   :  { %1054 = vst.msk [vmem:[#allocation2 + $0x8] sm:$0xff] %vm305_vm13, %v1052_v18 }
 0x797   :  { %1414 = shalt.err (!%p1411_p12)
}
 0x798   :  { %s1415_s12 = scalar_lea.hbm %s1958_s9, 256 }
 0x799   :  { %p1416_p13 = scmp.ne.s32.totalorder %s1958_s9, %s1415_s12  ;;  %p1419_p0 = scmp.lt.u32.totalorder %s1415_s12, %s1958_s9 }
 0x79b   :  { %p1421_p1 = pnand %p1419_p0, %p1416_p13 }
 0x79d   :  { %1424 = shalt.err (!%p1421_p1)
}
 0x79e   :  { %1066 = dma.vmem_to_hbm [thread:$0]  %s1061_s30, 256, %s1958_s9, [#allocation3], %s1434_s3, %s1434_s3, %s1435_s29  }
 0x79f   :  { %1425 = dma.done.wait [#allocation3], 256  }
 0x7a0   :  { %1426 = vsyncadd [#allocation3], 4294967040 }
 0x7a1   :  { %1427 = dma.done.wait [#allocation5], 256  }
 0x7a2   :  { %1428 = vsyncadd [#allocation5], 4294967040 }
 0x7a3   :  { %1085 = vsyncpa [#allocation3], 1 }
 0x7a4   :  { %1086 = vsyncpa [#allocation5], 1 }

</bundles_post_ra>
